<compile_context>
chip_gen: v7x
topology: tpu7x:2x2x1
jax: 0.10.0
libtpu: 0.0.40
codegen_flags: <defaults>
</compile_context>

<pallas_src>
import math
import functools

import jax
import jax.numpy as jnp
from jax.experimental import pallas as pl
from jax.experimental.pallas import tpu as pltpu


def _round_up(x, m):
    return (x + m - 1) // m * m


# ---------------------------------------------------------------------------
# Pallas kernel: fused conv (as K*K shifted dots) + bias + ReLU for one image.
#   x_ref : (1, C, L)       zero-padded image, spatial dims flattened (row = Wp)
#   w_ref : (K*K, O, C)     weights, tap-major (resident, constant index map)
#   b_ref : (O, 1)          bias
#   o_ref : (1, O, Td)      dense stride-1 output, Td = lane-padded Hd*Wp
# ---------------------------------------------------------------------------
def _conv_bias_relu_kernel(x_ref, w_ref, b_ref, o_ref, *, K, Wp, Td):
    O = o_ref.shape[1]
    acc = jnp.zeros((O, Td), jnp.float32)
    for kh in range(K):                      # static unroll: K*K MXU dots
        for kw in range(K):
            off = kh * Wp + kw               # static lane offset
            xs = x_ref[0, :, pl.ds(off, Td)]            # (C, Td) lane-dense
            wk = w_ref[kh * K + kw]                     # (O, C)
            acc = acc + jnp.dot(wk, xs, preferred_element_type=jnp.float32)
    acc = acc + b_ref[...]                              # (O, 1) lane-broadcast
    o_ref[0] = jnp.maximum(acc, 0.0).astype(o_ref.dtype)


# ---------------------------------------------------------------------------
# ConvBayesian forward (deterministic, no IBP, relu activation), NCHW/OIHW.
# ---------------------------------------------------------------------------
def conv_bayesian_forward(x_nchw, weight_oihw, bias_o, *, stride, padding):
    """relu(conv2d(x, W, b, stride, padding)), matching F.conv2d semantics."""
    N, C, H, W = x_nchw.shape
    O, Ci, K, K2 = weight_oihw.shape
    assert Ci == C and K == K2

    s, p = stride, padding
    Hp, Wp = H + 2 * p, W + 2 * p
    Ho = (Hp - K) // s + 1                 # strided output size
    Wo = (Wp - K) // s + 1
    Hd = Hp - K + 1                        # dense (stride-1) output rows
    Td = Hd * Wp                           # dense flattened output length
    Td_pad = _round_up(Td, 128)            # lane-dense output tile

    # Flattened zero-padded input.  Extra bottom rows of zeros cover both the
    # conv halo and the Td -> Td_pad lane padding; reshape is free (row-major).
    needed = Td_pad + (K - 1) * (Wp + 1)
    extra = max(0, needed - Hp * Wp)
    extra_rows = (extra + Wp - 1) // Wp
    L = (Hp + extra_rows) * Wp
    xp = jnp.pad(x_nchw, ((0, 0), (0, 0), (p, p + extra_rows), (p, p)))
    x_flat = xp.reshape(N, C, L)

    # weight OIHW -> (K*K, O, C): one (O, C) slab per kernel tap (tiny).
    w_r = jnp.transpose(weight_oihw, (2, 3, 0, 1)).reshape(K * K, O, C)
    bias2d = bias_o.reshape(O, 1)

    kernel = functools.partial(_conv_bias_relu_kernel, K=K, Wp=Wp, Td=Td_pad)

    # NOTE: for production channel counts / large images the per-image block
    # (C, L) should additionally be tiled over output rows (with halo) and C;
    # at the module's shapes everything fits comfortably in VMEM.
    out_dense = pl.pallas_call(
        kernel,
        out_shape=jax.ShapeDtypeStruct((N, O, Td_pad), x_nchw.dtype),
        grid_spec=pltpu.PrefetchScalarGridSpec(
            num_scalar_prefetch=0,
            grid=(N,),
            in_specs=[
                pl.BlockSpec((1, C, L), lambda n: (n, 0, 0)),       # streamed
                pl.BlockSpec((K * K, O, C), lambda n: (0, 0, 0)),   # resident
                pl.BlockSpec((O, 1), lambda n: (0, 0)),             # resident
            ],
            out_specs=pl.BlockSpec((1, O, Td_pad), lambda n: (n, 0, 0)),
        ),
        compiler_params=pltpu.CompilerParams(
            dimension_semantics=("parallel",),
            vmem_limit_bytes=32 * 1024 * 1024,
        ),
    )(x_flat, w_r, bias2d)

    # Trim lane padding, un-flatten rows (free-ish), drop wrap-around garbage
    # columns and apply the stride.  Output is already channel-major => NCHW.
    dense = out_dense[:, :, :Td].reshape(N, O, Hd, Wp)
    out = dense[:, :, : (Ho - 1) * s + 1 : s, : (Wo - 1) * s + 1 : s]
    return out


# ---------------------------------------------------------------------------
# Deterministic parameter init (mirrors reset_parameters for this config).
# ---------------------------------------------------------------------------
def init_params(key, in_channels, out_channels, kernel_size):
    k_w, k_b = jax.random.split(key)
    fan_in = in_channels * kernel_size * kernel_size
    fan_out = out_channels * kernel_size * kernel_size
    # xavier_normal_
    std = math.sqrt(2.0 / (fan_in + fan_out))
    posterior_mean = std * jax.random.normal(
        k_w, (out_channels, in_channels, kernel_size, kernel_size), jnp.float32)
    # bias: uniform(-1/sqrt(fan_in), 1/sqrt(fan_in))
    bound = 1.0 / math.sqrt(fan_in)
    bias_mean = jax.random.uniform(
        k_b, (out_channels,), jnp.float32, minval=-bound, maxval=bound)
    return posterior_mean, bias_mean


if __name__ == "__main__":
    # Module config: ConvBayesian(in=4, out=8, kernel=3, stride=1, padding=1,
    #                             competitors=1, activation='relu',
    #                             deterministic=True, ibp=False, bias=True)
    N, C, H, W = 2, 4, 16, 16
    O, K, stride, padding = 8, 3, 1, 1

    key = jax.random.PRNGKey(0)
    k_x, k_p = jax.random.split(key)
    x = jax.random.normal(k_x, (N, C, H, W), jnp.float32)
    weight, bias = init_params(k_p, C, O, K)

    fwd = jax.jit(functools.partial(conv_bayesian_forward,
                                    stride=stride, padding=padding))
    out = fwd(x, weight, bias)
    jax.block_until_ready(out)

    # Reference check against XLA's conv (same semantics as F.conv2d + relu).
    ref = jax.lax.conv_general_dilated(
        x, weight, window_strides=(stride, stride),
        padding=[(padding, padding), (padding, padding)],
        dimension_numbers=("NCHW", "OIHW", "NCHW"))
    ref = jnp.maximum(ref + bias.reshape(1, O, 1, 1), 0.0)
    assert out.shape == (N, O, H, W)
    assert jnp.allclose(out, ref, atol=1e-4, rtol=1e-4), "mismatch vs reference conv"

    # TODO(synk): 'lwta' activation and the non-deterministic / IBP branches need
    # Gumbel / Kumaraswamy sampling helpers not defined in the reference snippet.
    print("KERNEL_OK")
</pallas_src>

<mosaic_0001>
module attributes {stable_mosaic.version = 11 : i64} {
  func.func @_conv_bias_relu_kernel(%arg0: i32, %arg1: memref<1x4x432xf32, #tpu.memory_space<vmem>>, %arg2: memref<9x8x4xf32, #tpu.memory_space<vmem>>, %arg3: memref<8x1xf32, #tpu.memory_space<vmem>>, %arg4: memref<1x8x384xf32, #tpu.memory_space<vmem>>) attributes {dimension_semantics = [#tpu.dimension_semantics<parallel>], iteration_bounds = array<i64: 2>, scalar_prefetch = 0 : i64, scratch_operands = 0 : i64, tpu.core_type = #tpu.core_type<tc>, window_params = [{transform_indices = @transform_0, window_bounds = array<i64: 1, 4, 432>}, {pipeline_mode = #tpu.pipeline_mode<synchronous>, transform_indices = @transform_1, window_bounds = array<i64: 9, 8, 4>}, {pipeline_mode = #tpu.pipeline_mode<synchronous>, transform_indices = @transform_2, window_bounds = array<i64: 8, 1>}, {transform_indices = @transform_3, window_bounds = array<i64: 1, 8, 384>}]} {
    %cst = arith.constant 0.000000e+00 : f32
    %0 = vector.broadcast %cst : f32 to vector<8x384xf32>
    %c0 = arith.constant 0 : index
    %c0_0 = arith.constant 0 : index
    %c0_1 = arith.constant 0 : index
    %1 = vector.load %arg1[%c0, %c0_0, %c0_1] : memref<1x4x432xf32, #tpu.memory_space<vmem>>, vector<1x4x384xf32>
    %2 = vector.shape_cast %1 : vector<1x4x384xf32> to vector<4x384xf32>
    %c0_2 = arith.constant 0 : index
    %c0_3 = arith.constant 0 : index
    %c0_4 = arith.constant 0 : index
    %3 = vector.load %arg2[%c0_2, %c0_3, %c0_4] : memref<9x8x4xf32, #tpu.memory_space<vmem>>, vector<1x8x4xf32>
    %4 = vector.shape_cast %3 : vector<1x8x4xf32> to vector<8x4xf32>
    %cst_5 = arith.constant dense<0.000000e+00> : vector<8x384xf32>
    %5 = tpu.matmul %4, %2, %cst_5 {dimension_numbers = #tpu.dot_dimension_numbers<[1], [0], [0], [1], [0, 0, 1, 1], [], []>} : vector<8x4xf32>, vector<4x384xf32>, vector<8x384xf32> -> vector<8x384xf32>
    %6 = arith.addf %0, %5 : vector<8x384xf32>
    %c0_6 = arith.constant 0 : index
    %c0_7 = arith.constant 0 : index
    %c1 = arith.constant 1 : index
    %7 = vector.load %arg1[%c0_6, %c0_7, %c1] : memref<1x4x432xf32, #tpu.memory_space<vmem>>, vector<1x4x384xf32>
    %8 = vector.shape_cast %7 : vector<1x4x384xf32> to vector<4x384xf32>
    %c1_8 = arith.constant 1 : index
    %c0_9 = arith.constant 0 : index
    %c0_10 = arith.constant 0 : index
    %9 = vector.load %arg2[%c1_8, %c0_9, %c0_10] : memref<9x8x4xf32, #tpu.memory_space<vmem>>, vector<1x8x4xf32>
    %10 = vector.shape_cast %9 : vector<1x8x4xf32> to vector<8x4xf32>
    %cst_11 = arith.constant dense<0.000000e+00> : vector<8x384xf32>
    %11 = tpu.matmul %10, %8, %cst_11 {dimension_numbers = #tpu.dot_dimension_numbers<[1], [0], [0], [1], [0, 0, 1, 1], [], []>} : vector<8x4xf32>, vector<4x384xf32>, vector<8x384xf32> -> vector<8x384xf32>
    %12 = arith.addf %6, %11 : vector<8x384xf32>
    %c0_12 = arith.constant 0 : index
    %c0_13 = arith.constant 0 : index
    %c2 = arith.constant 2 : index
    %13 = vector.load %arg1[%c0_12, %c0_13, %c2] : memref<1x4x432xf32, #tpu.memory_space<vmem>>, vector<1x4x384xf32>
    %14 = vector.shape_cast %13 : vector<1x4x384xf32> to vector<4x384xf32>
    %c2_14 = arith.constant 2 : index
    %c0_15 = arith.constant 0 : index
    %c0_16 = arith.constant 0 : index
    %15 = vector.load %arg2[%c2_14, %c0_15, %c0_16] : memref<9x8x4xf32, #tpu.memory_space<vmem>>, vector<1x8x4xf32>
    %16 = vector.shape_cast %15 : vector<1x8x4xf32> to vector<8x4xf32>
    %cst_17 = arith.constant dense<0.000000e+00> : vector<8x384xf32>
    %17 = tpu.matmul %16, %14, %cst_17 {dimension_numbers = #tpu.dot_dimension_numbers<[1], [0], [0], [1], [0, 0, 1, 1], [], []>} : vector<8x4xf32>, vector<4x384xf32>, vector<8x384xf32> -> vector<8x384xf32>
    %18 = arith.addf %12, %17 : vector<8x384xf32>
    %c0_18 = arith.constant 0 : index
    %c0_19 = arith.constant 0 : index
    %c18 = arith.constant 18 : index
    %19 = vector.load %arg1[%c0_18, %c0_19, %c18] : memref<1x4x432xf32, #tpu.memory_space<vmem>>, vector<1x4x384xf32>
    %20 = vector.shape_cast %19 : vector<1x4x384xf32> to vector<4x384xf32>
    %c3 = arith.constant 3 : index
    %c0_20 = arith.constant 0 : index
    %c0_21 = arith.constant 0 : index
    %21 = vector.load %arg2[%c3, %c0_20, %c0_21] : memref<9x8x4xf32, #tpu.memory_space<vmem>>, vector<1x8x4xf32>
    %22 = vector.shape_cast %21 : vector<1x8x4xf32> to vector<8x4xf32>
    %cst_22 = arith.constant dense<0.000000e+00> : vector<8x384xf32>
    %23 = tpu.matmul %22, %20, %cst_22 {dimension_numbers = #tpu.dot_dimension_numbers<[1], [0], [0], [1], [0, 0, 1, 1], [], []>} : vector<8x4xf32>, vector<4x384xf32>, vector<8x384xf32> -> vector<8x384xf32>
    %24 = arith.addf %18, %23 : vector<8x384xf32>
    %c0_23 = arith.constant 0 : index
    %c0_24 = arith.constant 0 : index
    %c19 = arith.constant 19 : index
    %25 = vector.load %arg1[%c0_23, %c0_24, %c19] : memref<1x4x432xf32, #tpu.memory_space<vmem>>, vector<1x4x384xf32>
    %26 = vector.shape_cast %25 : vector<1x4x384xf32> to vector<4x384xf32>
    %c4 = arith.constant 4 : index
    %c0_25 = arith.constant 0 : index
    %c0_26 = arith.constant 0 : index
    %27 = vector.load %arg2[%c4, %c0_25, %c0_26] : memref<9x8x4xf32, #tpu.memory_space<vmem>>, vector<1x8x4xf32>
    %28 = vector.shape_cast %27 : vector<1x8x4xf32> to vector<8x4xf32>
    %cst_27 = arith.constant dense<0.000000e+00> : vector<8x384xf32>
    %29 = tpu.matmul %28, %26, %cst_27 {dimension_numbers = #tpu.dot_dimension_numbers<[1], [0], [0], [1], [0, 0, 1, 1], [], []>} : vector<8x4xf32>, vector<4x384xf32>, vector<8x384xf32> -> vector<8x384xf32>
    %30 = arith.addf %24, %29 : vector<8x384xf32>
    %c0_28 = arith.constant 0 : index
    %c0_29 = arith.constant 0 : index
    %c20 = arith.constant 20 : index
    %31 = vector.load %arg1[%c0_28, %c0_29, %c20] : memref<1x4x432xf32, #tpu.memory_space<vmem>>, vector<1x4x384xf32>
    %32 = vector.shape_cast %31 : vector<1x4x384xf32> to vector<4x384xf32>
    %c5 = arith.constant 5 : index
    %c0_30 = arith.constant 0 : index
    %c0_31 = arith.constant 0 : index
    %33 = vector.load %arg2[%c5, %c0_30, %c0_31] : memref<9x8x4xf32, #tpu.memory_space<vmem>>, vector<1x8x4xf32>
    %34 = vector.shape_cast %33 : vector<1x8x4xf32> to vector<8x4xf32>
    %cst_32 = arith.constant dense<0.000000e+00> : vector<8x384xf32>
    %35 = tpu.matmul %34, %32, %cst_32 {dimension_numbers = #tpu.dot_dimension_numbers<[1], [0], [0], [1], [0, 0, 1, 1], [], []>} : vector<8x4xf32>, vector<4x384xf32>, vector<8x384xf32> -> vector<8x384xf32>
    %36 = arith.addf %30, %35 : vector<8x384xf32>
    %c0_33 = arith.constant 0 : index
    %c0_34 = arith.constant 0 : index
    %c36 = arith.constant 36 : index
    %37 = vector.load %arg1[%c0_33, %c0_34, %c36] : memref<1x4x432xf32, #tpu.memory_space<vmem>>, vector<1x4x384xf32>
    %38 = vector.shape_cast %37 : vector<1x4x384xf32> to vector<4x384xf32>
    %c6 = arith.constant 6 : index
    %c0_35 = arith.constant 0 : index
    %c0_36 = arith.constant 0 : index
    %39 = vector.load %arg2[%c6, %c0_35, %c0_36] : memref<9x8x4xf32, #tpu.memory_space<vmem>>, vector<1x8x4xf32>
    %40 = vector.shape_cast %39 : vector<1x8x4xf32> to vector<8x4xf32>
    %cst_37 = arith.constant dense<0.000000e+00> : vector<8x384xf32>
    %41 = tpu.matmul %40, %38, %cst_37 {dimension_numbers = #tpu.dot_dimension_numbers<[1], [0], [0], [1], [0, 0, 1, 1], [], []>} : vector<8x4xf32>, vector<4x384xf32>, vector<8x384xf32> -> vector<8x384xf32>
    %42 = arith.addf %36, %41 : vector<8x384xf32>
    %c0_38 = arith.constant 0 : index
    %c0_39 = arith.constant 0 : index
    %c37 = arith.constant 37 : index
    %43 = vector.load %arg1[%c0_38, %c0_39, %c37] : memref<1x4x432xf32, #tpu.memory_space<vmem>>, vector<1x4x384xf32>
    %44 = vector.shape_cast %43 : vector<1x4x384xf32> to vector<4x384xf32>
    %c7 = arith.constant 7 : index
    %c0_40 = arith.constant 0 : index
    %c0_41 = arith.constant 0 : index
    %45 = vector.load %arg2[%c7, %c0_40, %c0_41] : memref<9x8x4xf32, #tpu.memory_space<vmem>>, vector<1x8x4xf32>
    %46 = vector.shape_cast %45 : vector<1x8x4xf32> to vector<8x4xf32>
    %cst_42 = arith.constant dense<0.000000e+00> : vector<8x384xf32>
    %47 = tpu.matmul %46, %44, %cst_42 {dimension_numbers = #tpu.dot_dimension_numbers<[1], [0], [0], [1], [0, 0, 1, 1], [], []>} : vector<8x4xf32>, vector<4x384xf32>, vector<8x384xf32> -> vector<8x384xf32>
    %48 = arith.addf %42, %47 : vector<8x384xf32>
    %c0_43 = arith.constant 0 : index
    %c0_44 = arith.constant 0 : index
    %c38 = arith.constant 38 : index
    %49 = vector.load %arg1[%c0_43, %c0_44, %c38] : memref<1x4x432xf32, #tpu.memory_space<vmem>>, vector<1x4x384xf32>
    %50 = vector.shape_cast %49 : vector<1x4x384xf32> to vector<4x384xf32>
    %c8 = arith.constant 8 : index
    %c0_45 = arith.constant 0 : index
    %c0_46 = arith.constant 0 : index
    %51 = vector.load %arg2[%c8, %c0_45, %c0_46] : memref<9x8x4xf32, #tpu.memory_space<vmem>>, vector<1x8x4xf32>
    %52 = vector.shape_cast %51 : vector<1x8x4xf32> to vector<8x4xf32>
    %cst_47 = arith.constant dense<0.000000e+00> : vector<8x384xf32>
    %53 = tpu.matmul %52, %50, %cst_47 {dimension_numbers = #tpu.dot_dimension_numbers<[1], [0], [0], [1], [0, 0, 1, 1], [], []>} : vector<8x4xf32>, vector<4x384xf32>, vector<8x384xf32> -> vector<8x384xf32>
    %54 = arith.addf %48, %53 : vector<8x384xf32>
    %c0_48 = arith.constant 0 : index
    %c0_49 = arith.constant 0 : index
    %55 = vector.load %arg3[%c0_48, %c0_49] : memref<8x1xf32, #tpu.memory_space<vmem>>, vector<8x1xf32>
    %56 = vector.broadcast %55 : vector<8x1xf32> to vector<8x384xf32>
    %57 = arith.addf %54, %56 : vector<8x384xf32>
    %cst_50 = arith.constant 0.000000e+00 : f32
    %58 = vector.broadcast %cst_50 : f32 to vector<8x384xf32>
    %59 = arith.maximumf %57, %58 : vector<8x384xf32>
    %c0_51 = arith.constant 0 : index
    %c0_52 = arith.constant 0 : index
    %c0_53 = arith.constant 0 : index
    %60 = vector.load %arg4[%c0_51, %c0_52, %c0_53] : memref<1x8x384xf32, #tpu.memory_space<vmem>>, vector<1x8x384xf32>
    %61 = vector.shape_cast %60 : vector<1x8x384xf32> to vector<8x384xf32>
    %62 = vector.shape_cast %59 : vector<8x384xf32> to vector<1x8x384xf32>
    tpu.vector_store %arg4[%c0_51, %c0_52, %c0_53], %62 {strides = array<i32>} : memref<1x8x384xf32, #tpu.memory_space<vmem>>, vector<1x8x384xf32>,
    return
  }
  func.func @transform_0(%arg0: i32) -> (i32, i32, i32) {
    %c0_i32 = arith.constant 0 : i32
    %c0_i32_0 = arith.constant 0 : i32
    %c0_i32_1 = arith.constant 0 : i32
    return %arg0, %c0_i32, %c0_i32_0 : i32, i32, i32
  }
  func.func @transform_1(%arg0: i32) -> (i32, i32, i32) {
    %c0_i32 = arith.constant 0 : i32
    %c0_i32_0 = arith.constant 0 : i32
    %c0_i32_1 = arith.constant 0 : i32
    %c0_i32_2 = arith.constant 0 : i32
    return %c0_i32, %c0_i32_0, %c0_i32_1 : i32, i32, i32
  }
  func.func @transform_2(%arg0: i32) -> (i32, i32) {
    %c0_i32 = arith.constant 0 : i32
    %c0_i32_0 = arith.constant 0 : i32
    %c0_i32_1 = arith.constant 0 : i32
    return %c0_i32, %c0_i32_0 : i32, i32
  }
  func.func @transform_3(%arg0: i32) -> (i32, i32, i32) {
    %c0_i32 = arith.constant 0 : i32
    %c0_i32_0 = arith.constant 0 : i32
    %c0_i32_1 = arith.constant 0 : i32
    return %arg0, %c0_i32, %c0_i32_0 : i32, i32, i32
  }
}

</mosaic_0001>

<bundles_post_ra>
// kernel: conv_bayesian_forward.1
= control target key start
LH: loop header
LB: loop body
LE: loop exit
PB: predicated region body
PF: predicated region fallthrough
CT: control target
= control target key end

     0   :  { %s1982_s12 = smov 0   ;;  %s2153_s0 = inlined_call_operand.vmem [shape: f32[2,4,432], index: 0, kind: input, shape index: {}]   ;;  %s2154_s1 = inlined_call_operand.vmem [shape: f32[9,8,4], index: 1, kind: input, shape index: {}]   ;;  %s2155_s2 = inlined_call_operand.vmem [shape: f32[8,1], index: 2, kind: input, shape index: {}]   ;;  %s2156_s3 = inlined_call_operand.vmem [shape: f32[2,8,384], index: 3, kind: output, shape index: {}]  }
   0x1 LB: > { %s1777_s13 = sadd.s32 4294967295, %s1949_s12   ;;  %p1781_p0 = scmp.ge.s32.totalorder %s1949_s12, 1  ;;  %s1949_s12 = sphi %s1982_s12, %s13_s12  }
   0x2   : > { %p137_p1 = scmp.lt.s32.totalorder %s1949_s12, 3 }
   0x4   : > { %p138_p2 = pnand %p1781_p0, %p137_p1 }
   0x5   : > { %p161_p3 = scmp.lt.s32.totalorder (!%p138_p2), %s1777_s13, 1  ;;  %v1951_v0 = vmov (!%p138_p2), 0.0   ;;  %s1952_s18 = smov (!%p138_p2), 127   ;;  %vm1954_vm0 = vmmov (!%p138_p2), 0   ;;  %v1961_v5 = vmov (!%p138_p2), 0   ;;  %v1707_v6 = vld [vmem:[%s2155_s2] sm:$0xff] (!%p138_p2) }
   0x6   : > { %141 = sbr.rel (%p138_p2) target bundleno = 423 (0x1a7), region = 32  ;;  %268 = vmatprep.mubr.f32.mxu0 (!%p138_p2), %v1951_v0  ;;  %1859 = vmatprep.subr.mxu1 (!%p138_p2), %v1951_v0  ;;  %s1953_s19 = smov (!%p138_p2), 126   ;;  %vm189_vm1 = vcmask (!%p138_p2), 1039360   ;;  %vm197_vm2 = vcmask (!%p138_p2), 1043456   ;;  %v1785_v12 = vld [vmem:[%s2154_s1 + $0x8] sm:$0xff] (!%p138_p2)  ;;  %vm193_vm3 = vcmask (!%p138_p2), 31744  }
   0x7   : > { %1861 = vmatprep.mubr.msk.f32.mxu1 (!%p138_p2), %vm1954_vm0, %v1951_v0  ;;  %s1955_s20 = smov (!%p138_p2), 110   ;;  %s1956_s21 = smov (!%p138_p2), 109   ;;  %1940 = vset.pattern.permute.xlu0 (!%p138_p2), %v1961_v5  ;;  %vm512_vm4 = vcmask (!%p138_p2), 1031168   ;;  %vm685_vm5 = vcmask (!%p138_p2), 900096   ;;  %v173_v19 = vld [vmem:[%s2154_s1] sm:$0xff] (!%p138_p2)  ;;  %vm858_vm6 = vcmask (!%p138_p2), 891904  }
   0x8   : > { %s1957_s22 = smov (!%p138_p2), 108   ;;  %s1958_s23 = smov (!%p138_p2), 92   ;;  %v1796_v28 = vld [vmem:[%s2154_s1 + $0x10] sm:$0xff] (!%p138_p2)  ;;  %vm1031_vm7 = vcmask (!%p138_p2), 883712   ;;  %v1802_v36 = vld [vmem:[%s2154_s1 + $0x18] sm:$0xff] (!%p138_p2)  ;;  %v1808_v45 = vld [vmem:[%s2154_s1 + $0x20] sm:$0xff] (!%p138_p2) }
   0x9   : > { %s1959_s24 = smov (!%p138_p2), 91   ;;  %s1960_s25 = smov (!%p138_p2), 90   ;;  %vm1204_vm8 = vcmask (!%p138_p2), 752640   ;;  %v1814_v52 = vld [vmem:[%s2154_s1 + $0x28] sm:$0xff] (!%p138_p2)  ;;  %vm1377_vm9 = vcmask (!%p138_p2), 744448   ;;  %v1820_v58 = vld [vmem:[%s2154_s1 + $0x30] sm:$0xff] (!%p138_p2) }
   0xa   : > { %v1826_v63 = vld [vmem:[%s2154_s1 + $0x38] sm:$0xff] (!%p138_p2)  ;;  %vm1550_vm10 = vcmask (!%p138_p2), 736256  }
   0xd   : > { %s2158_s13 = smov (!%p161_p3, %s1777_s13), 1 }
   0xe   : > { %s1840_s14 = sshll.u32 %s2158_s13, 4 }
   0xf   : > { %s1998_s17 = scalar_lea.vmem %s2153_s0, %s1840_s14 }
  0x10   : > { %v2001_v1 = vld [vmem:[%s1998_s17] sm:$0xff]  ;;  %v174_v3 = vld [vmem:[%s1998_s17 + $0x8] sm:$0xff] }
  0x11   : > { %181 = vrot.lane.b32.xlu1 %v2001_v1, %s1952_s18  ;;  %v179_v2 = vcombine.high %v2001_v1, %v2001_v1  ;;  %v180_v4 = vcombine.high %v174_v3, %v174_v3  ;;  %v172_v25 = vld [vmem:[%s1998_s17 + $0x8] sm:$0xf] }
  0x13   : > { %183 = vrot.lane.b32.xlu0 %v179_v2, %s1952_s18 }
  0x15   : > { %504 = vrot.lane.b32.xlu1 %v2001_v1, %s1953_s19 }
  0x17   : > { %185 = vrot.lane.b32.xlu0 %v174_v3, %s1952_s18 }
  0x19   : > { %506 = vrot.lane.b32.xlu1 %v179_v2, %s1953_s19 }
  0x1b   : > { %508 = vrot.lane.b32.xlu0 %v174_v3, %s1953_s19 }
  0x1d   : > { %681 = vrot.lane.b32.xlu1 %v174_v3, %s1955_s20 }
  0x1f   : > { %679 = vrot.lane.b32.xlu0 %v179_v2, %s1955_s20 }
  0x21   : > { %187 = vrot.lane.b32.xlu1 %v180_v4, %s1952_s18 }
  0x23   : > { %677 = vrot.lane.b32.xlu0 %v2001_v1, %s1955_s20 }
  0x25   : > { %854 = vrot.lane.b32.xlu1 %v174_v3, %s1956_s21 }
  0x27   : > { %852 = vrot.lane.b32.xlu0 %v179_v2, %s1956_s21 }
  0x29   : > { %510 = vrot.lane.b32.xlu1 %v180_v4, %s1953_s19 }
  0x2b   : > { %850 = vrot.lane.b32.xlu0 %v2001_v1, %s1956_s21 }
  0x2d   : > { %1027 = vrot.lane.b32.xlu1 %v174_v3, %s1957_s22 }
  0x2f   : > { %1025 = vrot.lane.b32.xlu0 %v179_v2, %s1957_s22 }
  0x31   : > { %683 = vrot.lane.b32.xlu1 %v180_v4, %s1955_s20 }
  0x33   : > { %1023 = vrot.lane.b32.xlu0 %v2001_v1, %s1957_s22 }
  0x35   : > { %1198 = vrot.lane.b32.xlu1 %v179_v2, %s1958_s23 }
  0x37   : > { %856 = vrot.lane.b32.xlu0 %v180_v4, %s1956_s21  ;;  %s1920_s21 = smul.u32 24, %s2158_s13 }
  0x39   : > { %1196 = vrot.lane.b32.xlu1 %v2001_v1, %s1958_s23 }
  0x3b   : > { %1200 = vrot.lane.b32.xlu0 %v174_v3, %s1958_s23 }
  0x3d   : > { %1202 = vrot.lane.b32.xlu1 %v180_v4, %s1958_s23 }
  0x3f   : > { %1029 = vrot.lane.b32.xlu0 %v180_v4, %s1957_s22 }
  0x41   : > { %1373 = vrot.lane.b32.xlu1 %v174_v3, %s1959_s24 }
  0x43   : > { %1371 = vrot.lane.b32.xlu0 %v179_v2, %s1959_s24 }
  0x45   : > { %1375 = vrot.lane.b32.xlu1 %v180_v4, %s1959_s24 }
  0x47   : > { %1369 = vrot.lane.b32.xlu0 %v2001_v1, %s1959_s24  ;;  %s170_s24 = scalar_lea.vmem %s2156_s3, %s1920_s21 }
  0x49   : > { %1546 = vrot.lane.b32.xlu1 %v174_v3, %s1960_s25 }
  0x4b   : > { %1544 = vrot.lane.b32.xlu0 %v179_v2, %s1960_s25 }
  0x4d   : > { %1542 = vrot.lane.b32.xlu1 %v2001_v1, %s1960_s25 }
  0x4f   : > { %1548 = vrot.lane.b32.xlu0 %v180_v4, %s1960_s25 }
  0x53   : > { %1710 = vperm.xlu0 %1940, %v1707_v6  }
  0x83   : > { %v182_v7 = vpop.permute.xlu1 %181 }
  0x85   : > { %v184_v8 = vpop.permute.xlu0 %183 }
  0x86   : > { %v190_v14 = vsel %vm189_vm1, %v182_v7, %v184_v8  ;;  %v1832_v7 = vld [vmem:[%s2154_s1 + $0x40] sm:$0xff] }
  0x87   : > { %v505_v9 = vpop.permute.xlu1 %504 }
  0x89   : > { %v186_v10 = vpop.permute.xlu0 %185 }
  0x8a   : > { %v191_v11 = vsel %vm189_vm1, %v184_v8, %v186_v10 }
  0x8b   : > { %v507_v13 = vpop.permute.xlu1 %506  ;;  %1786 = vmatprep.subr.msk.mxu0 %vm197_vm2, %v191_v11 }
  0x8c   : > { %1787 = vmatpush1.msk.msra.mxu0 %vm197_vm2, %v190_v14  ;;  %v513_v20 = vsel %vm512_vm4, %v505_v9, %v507_v13 }
  0x8d   : > { %1788 = vmatmul.mubr.msk.f32.vlgmr.msra.gmra.mrb[0].mxu0 %vm193_vm3, %v1785_v12  ;;  %1791 = vmatprep.subr.msk.mxu0 %vm197_vm2, %v179_v2  ;;  %v509_v15 = vpop.permute.xlu0 %508 }
  0x8e   : > { %v514_v16 = vsel %vm512_vm4, %v507_v13, %v509_v15  ;;  %1792 = vmatpush1.msk.msra.mxu0 %vm197_vm2, %v2001_v1  ;;  %419 = vmatprep.mubr.f32.mxu0 %v1951_v0 }
  0x8f   : > { %v682_v17 = vpop.permute.xlu1 %681  ;;  %1797 = vmatprep.subr.msk.mxu0 %vm197_vm2, %v514_v16 }
  0x91   : > { %v680_v18 = vpop.permute.xlu0 %679 }
  0x92   : > { %v687_v22 = vsel %vm685_vm5, %v680_v18, %v682_v17 }
  0x93   : > { %v188_v21 = vpop.permute.xlu1 %187 }
  0x94   : > { %v192_v23 = vsel %vm189_vm1, %v186_v10, %v188_v21 }
  0x95   : > { %1860 = vmatpush3.msk.msra.mxu1 %vm197_vm2, %v192_v23  ;;  %1793 = vmatmul.mubr.msk.f32.vlgmr.msra.gmra.mrb[0].mxu0 %vm193_vm3, %v173_v19  ;;  %v678_v24 = vpop.permute.xlu0 %677 }
  0x96   : > { %1798 = vmatpush1.msk.msra.mxu0 %vm197_vm2, %v513_v20  ;;  %1862 = vmatmul.mubr.msk.f32.vlgmr.msra.gmra.mrb[0].mxu1 %vm193_vm3, %v1785_v12  ;;  %v686_v32 = vsel %vm685_vm5, %v678_v24, %v680_v18 }
  0x97   : > { %1803 = vmatprep.subr.msk.mxu0 %vm197_vm2, %v687_v22  ;;  %v855_v26 = vpop.permute.xlu1 %854  ;;  %1864 = vmatprep.subr.mxu1 %v1951_v0 }
  0x98   : > { %1865 = vmatpush3.msk.msra.mxu1 %vm197_vm2, %v172_v25  ;;  %1866 = vmatprep.mubr.msk.f32.mxu1 %vm1954_vm0, %v1951_v0 }
  0x99   : > { %v853_v27 = vpop.permute.xlu0 %852  ;;  %589 = vmatprep.mubr.f32.mxu0 %v1951_v0  ;;  %1869 = vmatprep.subr.mxu1 %v1951_v0 }
  0x9a   : > { %1867 = vmatmul.mubr.msk.f32.vlgmr.msra.gmra.mrb[2].mxu1 %vm193_vm3, %v173_v19  ;;  %v860_v30 = vsel %vm858_vm6, %v853_v27, %v855_v26 }
  0x9b   : > { %v511_v29 = vpop.permute.xlu1 %510  ;;  %1871 = vmatprep.mubr.msk.f32.mxu1 %vm1954_vm0, %v1951_v0 }
  0x9c   : > { %v515_v31 = vsel %vm512_vm4, %v509_v15, %v511_v29 }
  0x9d   : > { %1799 = vmatmul.mubr.msk.f32.vlgmr.msra.gmra.mrb[0].mxu0 %vm193_vm3, %v1796_v28  ;;  %1870 = vmatpush3.msk.msra.mxu1 %vm197_vm2, %v515_v31  ;;  %v851_v33 = vpop.permute.xlu0 %850 }
  0x9e   : > { %1804 = vmatpush1.msk.msra.mxu0 %vm197_vm2, %v686_v32  ;;  %762 = vmatprep.mubr.f32.mxu0 %v1951_v0  ;;  %v859_v40 = vsel %vm858_vm6, %v851_v33, %v853_v27 }
  0x9f   : > { %1809 = vmatprep.subr.msk.mxu0 %vm197_vm2, %v860_v30  ;;  %v1028_v34 = vpop.permute.xlu1 %1027  ;;  %1874 = vmatprep.subr.mxu1 %v1951_v0 }
  0xa0   : > { %1872 = vmatmul.mubr.msk.f32.vlgmr.msra.gmra.mrb[4].mxu1 %vm193_vm3, %v1796_v28 }
  0xa1   : > { %v1026_v35 = vpop.permute.xlu0 %1025  ;;  %1876 = vmatprep.mubr.msk.f32.mxu1 %vm1954_vm0, %v1951_v0 }
  0xa2   : > { %v1033_v38 = vsel %vm1031_vm7, %v1026_v35, %v1028_v34 }
  0xa3   : > { %v684_v37 = vpop.permute.xlu1 %683 }
  0xa4   : > { %v688_v39 = vsel %vm685_vm5, %v682_v17, %v684_v37 }
  0xa5   : > { %1805 = vmatmul.mubr.msk.f32.vlgmr.msra.gmra.mrb[0].mxu0 %vm193_vm3, %v1802_v36  ;;  %1875 = vmatpush3.msk.msra.mxu1 %vm197_vm2, %v688_v39  ;;  %v1024_v41 = vpop.permute.xlu0 %1023 }
  0xa6   : > { %1810 = vmatpush1.msk.msra.mxu0 %vm197_vm2, %v859_v40  ;;  %1879 = vmatprep.subr.mxu1 %v1951_v0  ;;  %v1032_v47 = vsel %vm1031_vm7, %v1024_v41, %v1026_v35 }
  0xa7   : > { %1815 = vmatprep.subr.msk.mxu0 %vm197_vm2, %v1033_v38  ;;  %v1199_v42 = vpop.permute.xlu1 %1198  ;;  %1877 = vmatmul.mubr.msk.f32.vlgmr.msra.gmra.mrb[6].mxu1 %vm193_vm3, %v1802_v36 }
  0xa8   : > { %935 = vmatprep.mubr.f32.mxu0 %v1951_v0  ;;  %1881 = vmatprep.mubr.msk.f32.mxu1 %vm1954_vm0, %v1951_v0 }
  0xa9   : > { %v857_v43 = vpop.permute.xlu0 %856 }
  0xaa   : > { %v861_v44 = vsel %vm858_vm6, %v855_v26, %v857_v43 }
  0xab   : > { %1880 = vmatpush3.msk.msra.mxu1 %vm197_vm2, %v861_v44  ;;  %v1197_v46 = vpop.permute.xlu1 %1196 }
  0xac   : > { %1882 = vmatmul.mubr.msk.f32.vlgmr.msra.gmra.mrb[8].mxu1 %vm193_vm3, %v1808_v45  ;;  %1884 = vmatprep.subr.mxu1 %v1951_v0  ;;  %v1205_v55 = vsel %vm1204_vm8, %v1197_v46, %v1199_v42 }
  0xad   : > { %1811 = vmatmul.mubr.msk.f32.vlgmr.msra.gmra.mrb[0].mxu0 %vm193_vm3, %v1808_v45  ;;  %v1201_v48 = vpop.permute.xlu0 %1200  ;;  %1886 = vmatprep.mubr.msk.f32.mxu1 %vm1954_vm0, %v1951_v0 }
  0xae   : > { %1816 = vmatpush1.msk.msra.mxu0 %vm197_vm2, %v1032_v47  ;;  %v1206_v49 = vsel %vm1204_vm8, %v1199_v42, %v1201_v48  ;;  %1108 = vmatprep.mubr.f32.mxu0 %v1951_v0 }
  0xaf   : > { %1821 = vmatprep.subr.msk.mxu0 %vm197_vm2, %v1206_v49  ;;  %v1203_v50 = vpop.permute.xlu1 %1202 }
  0xb0   : > { %v1207_v53 = vsel %vm1204_vm8, %v1201_v48, %v1203_v50 }
  0xb1   : > { %v1030_v51 = vpop.permute.xlu0 %1029 }
  0xb2   : > { %v1034_v54 = vsel %vm1031_vm7, %v1028_v34, %v1030_v51 }
  0xb3   : > { %1885 = vmatpush3.msk.msra.mxu1 %vm197_vm2, %v1034_v54  ;;  %v1374_v56 = vpop.permute.xlu1 %1373 }
  0xb4   : > { %1887 = vmatmul.mubr.msk.f32.vlgmr.msra.gmra.mrb[10].mxu1 %vm193_vm3, %v1814_v52  ;;  %1889 = vmatprep.subr.mxu1 %v1951_v0 }
  0xb5   : > { %1817 = vmatmul.mubr.msk.f32.vlgmr.msra.gmra.mrb[0].mxu0 %vm193_vm3, %v1814_v52  ;;  %1890 = vmatpush3.msk.msra.mxu1 %vm197_vm2, %v1207_v53  ;;  %v1372_v57 = vpop.permute.xlu0 %1371 }
  0xb6   : > { %1822 = vmatpush1.msk.msra.mxu0 %vm197_vm2, %v1205_v55  ;;  %v1379_v59 = vsel %vm1377_vm9, %v1372_v57, %v1374_v56  ;;  %1891 = vmatprep.mubr.msk.f32.mxu1 %vm1954_vm0, %v1951_v0 }
  0xb7   : > { %v1376_v60 = vpop.permute.xlu1 %1375  ;;  %1894 = vmatprep.subr.mxu1 %v1951_v0  ;;  %1827 = vmatprep.subr.msk.mxu0 %vm197_vm2, %v1379_v59 }
  0xb8   : > { %v1380_v61 = vsel %vm1377_vm9, %v1374_v56, %v1376_v60  ;;  %1892 = vmatmul.mubr.msk.f32.vlgmr.msra.gmra.mrb[12].mxu1 %vm193_vm3, %v1820_v58  ;;  %1281 = vmatprep.mubr.f32.mxu0 %v1951_v0 }
  0xb9   : > { %v1370_v62 = vpop.permute.xlu0 %1369  ;;  %1895 = vmatpush3.msk.msra.mxu1 %vm197_vm2, %v1380_v61  ;;  %1896 = vmatprep.mubr.msk.f32.mxu1 %vm1954_vm0, %v1951_v0 }
  0xba   : > { %1899 = vmatprep.subr.mxu1 %v1951_v0  ;;  %v1378_v1 = vsel %vm1377_vm9, %v1370_v62, %v1372_v57 }
  0xbb   : > { %v1547_v2 = vpop.permute.xlu1 %1546 }
  0xbc   : > { %1897 = vmatmul.mubr.msk.f32.vlgmr.msra.gmra.mrb[14].mxu1 %vm193_vm3, %v1826_v63 }
  0xbd   : > { %1823 = vmatmul.mubr.msk.f32.vlgmr.msra.gmra.mrb[0].mxu0 %vm193_vm3, %v1820_v58  ;;  %v1545_v3 = vpop.permute.xlu0 %1544  ;;  %1901 = vmatprep.mubr.msk.f32.mxu1 %vm1954_vm0, %v1951_v0 }
  0xbe   : > { %1828 = vmatpush1.msk.msra.mxu0 %vm197_vm2, %v1378_v1  ;;  %v1552_v4 = vsel %vm1550_vm10, %v1545_v3, %v1547_v2  ;;  %1454 = vmatprep.mubr.f32.mxu0 %v1951_v0 }
  0xbf   : > { %1833 = vmatprep.subr.msk.mxu0 %vm197_vm2, %v1552_v4  ;;  %v1543_v5 = vpop.permute.xlu1 %1542 }
  0xc0   : > { %v1551_v9 = vsel %vm1550_vm10, %v1543_v5, %v1545_v3 }
  0xc1   : > { %v1549_v6 = vpop.permute.xlu0 %1548 }
  0xc2   : > { %v1553_v8 = vsel %vm1550_vm10, %v1547_v2, %v1549_v6 }
  0xc3   : > { %1900 = vmatpush3.msk.msra.mxu1 %vm197_vm2, %v1553_v8 }
  0xc4   : > { %1902 = vmatmul.mubr.msk.f32.vlgmr.msra.gmra.mrb[16].mxu1 %vm193_vm3, %v1832_v7 }
  0xc5   : > { %1829 = vmatmul.mubr.msk.f32.vlgmr.msra.gmra.mrb[0].mxu0 %vm193_vm3, %v1826_v63 }
  0xc6   : > { %1834 = vmatpush1.msk.msra.mxu0 %vm197_vm2, %v1551_v9  ;;  %1627 = vmatprep.mubr.f32.mxu0 %v1951_v0 }
  0xcd   : > { %1835 = vmatmul.mubr.msk.f32.vlgmr.msra.gmra.mrb[0].mxu0 %vm193_vm3, %v1832_v7 }
  0xd2   : > { %v1711_v33 = vpop.permute.xlu0 %1710 }
 0x169   : > { %v341_v10 = vpop.f32.mrb[0].mxu1 }
 0x16a   : > { %v1863_v11 = vpop.f32.mrb[1].mxu1 }
 0x16d   : > { %v492_v12 = vpop.f32.mrb[2].mxu1 }
 0x16e   : > { %v493_v13 = vadd.f32 %v492_v12, %v341_v10  ;;  %v1868_v14 = vpop.f32.mrb[3].mxu1 }
 0x173   : > { %v662_v15 = vpop.f32.mrb[4].mxu1 }
 0x174   : > { %v668_v16 = vadd.f32 %v662_v15, %v493_v13  ;;  %v1873_v17 = vpop.f32.mrb[5].mxu1 }
 0x17a   : > { %v835_v18 = vpop.f32.mrb[6].mxu1 }
 0x17b   : > { %v841_v19 = vadd.f32 %v835_v18, %v668_v16  ;;  %v1878_v20 = vpop.f32.mrb[7].mxu1 }
 0x17f   : > { %v1008_v21 = vpop.f32.mrb[8].mxu1 }
 0x180   : > { %v1014_v22 = vadd.f32 %v1008_v21, %v841_v19  ;;  %v1883_v23 = vpop.f32.mrb[9].mxu1 }
 0x187   : > { %v1181_v24 = vpop.f32.mrb[10].mxu1 }
 0x188   : > { %v1187_v25 = vadd.f32 %v1181_v24, %v1014_v22  ;;  %v1888_v0 = vpop.f32.mrb[11].mxu1 }
 0x18b   : > { %v1354_v26 = vpop.f32.mrb[12].mxu1 }
 0x18c   : > { %v1360_v27 = vadd.f32 %v1354_v26, %v1187_v25  ;;  %v1893_v28 = vpop.f32.mrb[13].mxu1 }
 0x18f   : > { %v1527_v29 = vpop.f32.mrb[14].mxu1 }
 0x190   : > { %v1533_v30 = vadd.f32 %v1527_v29, %v1360_v27  ;;  %v1898_v31 = vpop.f32.mrb[15].mxu1 }
 0x197   : > { %v1700_v32 = vpop.f32.mrb[16].mxu1 }
 0x198   : > { %v1706_v34 = vadd.f32 %v1700_v32, %v1533_v30  ;;  %v1903_v35 = vpop.f32.mrb[17].mxu1 }
 0x19a   : > { %v1715_v36 = vadd.f32 %v1711_v33, %v1706_v34 }
 0x19c   : > { %v1718_v37 = vmax.f32 %v1715_v36, 0.0 }
 0x19e   : > { %1721 = vst [vmem:[%s170_s24 + $0x10] sm:$0xff] %v1718_v37 }
 0x1a0   : > { %v1629_v38 = vpop.f32.mrb[0].mxu0 }
 0x1a1   : > { %v1713_v39 = vadd.f32 %v1711_v33, %v1629_v38  ;;  %v1631_v40 = vpop.f32.mrb[1].mxu0 }
 0x1a2   : > { %v1714_v41 = vadd.f32 %v1711_v33, %v1631_v40 }
 0x1a3   : > { %v1716_v42 = vmax.f32 %v1713_v39, 0.0 }
 0x1a4   : > { %v1717_v43 = vmax.f32 %v1714_v41, 0.0 }
 0x1a5   : > { %1719 = vst [vmem:[%s170_s24] sm:$0xff] %v1716_v42 }
 0x1a6   : > { %1720 = vst [vmem:[%s170_s24 + $0x8] sm:$0xff] %v1717_v43 }
 0x1a7 PF: > { %s13_s12 = sadd.s32 1, %s1949_s12  }
 0x1a8   : > { %p10_p4 = scmp.ge.s32.totalorder %s13_s12, 4  }
 0x1aa   :  { %12 = sbr.rel (!%p10_p4) target bundleno = 1 (0x1), region = 70 }

</bundles_post_ra>
